<compile_context>
chip_gen: v7x
topology: tpu7x:2x2x1
jax: 0.10.0
libtpu: 0.0.40
codegen_flags: <defaults>
</compile_context>

<pallas_src>
import functools
import math

import jax
import jax.numpy as jnp
from jax.experimental import pallas as pl
from jax.experimental.pallas import tpu as pltpu


# Safe on every generation: v5e/v6e have 128 MiB physical VMEM, v7x has 64 MiB.
_VMEM_LIMIT = 48 * 1024 * 1024


def _round_up(x, m):
    return ((x + m - 1) // m) * m


# ----------------------------------------------------------------------------
# Pallas kernels
# ----------------------------------------------------------------------------
def _matmul_bias_act_kernel(x_ref, w_ref, b_ref, o_ref, *, relu):
    """o = relu(x @ w + bias); BN scale pre-folded into w, f32 accumulate."""
    acc = jnp.dot(x_ref[...], w_ref[...], preferred_element_type=jnp.float32)
    acc = acc + b_ref[...]
    if relu:
        acc = jnp.maximum(acc, 0.0)
    o_ref[...] = acc.astype(o_ref.dtype)


def _proj_pool_kernel(x_ref, w_ref, b_ref, o_ref, acc_ref, *, s_true, ts):
    """Fused 1x1 conv (+BN bias) + ReLU + global average pool over spatial S.

    Grid = (N, S_tiles); accumulate per-image sum in a (1, F) f32 scratch,
    normalize and store on the last spatial step (pattern P3).
    """
    s = pl.program_id(1)

    @pl.when(s == 0)
    def _init():
        acc_ref[...] = jnp.zeros_like(acc_ref)

    y = jnp.dot(x_ref[0], w_ref[...], preferred_element_type=jnp.float32)
    y = jnp.maximum(y + b_ref[...], 0.0)
    if s_true % ts != 0:
        # Mask zero-padded spatial rows: ReLU(bias) of a padded row could be
        # non-zero, so it must not leak into the mean.
        row = s * ts + jax.lax.broadcasted_iota(jnp.int32, (ts, 1), 0)
        y = jnp.where(row < s_true, y, 0.0)
    acc_ref[...] += jnp.sum(y, axis=0, keepdims=True)

    @pl.when(s == pl.num_programs(1) - 1)
    def _fini():
        # divide by the TRUE spatial count, not the padded one
        o_ref[0] = (acc_ref[...] * (1.0 / s_true)).astype(o_ref.dtype)


# ----------------------------------------------------------------------------
# Wrappers
# ----------------------------------------------------------------------------
def matmul_bn_relu(x, w, scale, bias, *, relu=True, tm=1024,
                   out_dtype=jnp.bfloat16):
    """y = relu((x @ (w * scale)) + bias) tiled over rows on the MXU.

    x: (M, K) im2col patches, w: (K, C), scale/bias: (C,) folded BN.
    Returns (M, C) in `out_dtype`.  If C < 128 the matmul is computed in a
    row-folded, lane-dense layout via a block-diagonal weight.
    """
    assert tm % 16 == 0
    M, K = x.shape
    Kw, C = w.shape
    assert K == Kw

    # Fold the BN scale into the weights: removes one operand + one VPU mul.
    w = w.astype(jnp.float32) * scale.astype(jnp.float32)[None, :]
    b = bias.astype(jnp.float32)

    # Lane-dense output fold: (M, C) row-major == (M/fold, fold*C) row-major.
    fold = 128 // C if (C < 128 and 128 % C == 0) else 1
    if fold > 1:
        w = jnp.kron(jnp.eye(fold, dtype=jnp.float32), w)   # (fold*K, fold*C)
        b = jnp.tile(b, fold)
        if M % fold:
            x = jnp.pad(x, ((0, fold - M % fold), (0, 0)))
    Kf, Cf = fold * K, fold * C
    rows = x.shape[0] // fold
    x = x.reshape(rows, Kf)                                   # free bitcast

    # Row tiling (bf16 sublane granularity = 16).
    tm_eff = tm if rows >= tm else _round_up(rows, 16)
    rows_p = _round_up(rows, tm_eff)
    if rows_p != rows:
        x = jnp.pad(x, ((0, rows_p - rows), (0, 0)))

    x = x.astype(jnp.bfloat16)
    w = w.astype(jnp.bfloat16)
    b = b.reshape(1, Cf)

    cost = pl.CostEstimate(
        flops=2 * rows_p * Kf * Cf,
        transcendentals=0,
        bytes_accessed=rows_p * Kf * 2 + Kf * Cf * 2 + rows_p * Cf * 2)

    out = pl.pallas_call(
        functools.partial(_matmul_bias_act_kernel, relu=relu),
        out_shape=jax.ShapeDtypeStruct((rows_p, Cf), out_dtype),
        grid_spec=pltpu.PrefetchScalarGridSpec(
            num_scalar_prefetch=0,
            grid=(rows_p // tm_eff,),
            in_specs=[
                pl.BlockSpec((tm_eff, Kf), lambda i: (i, 0)),
                pl.BlockSpec((Kf, Cf), lambda i: (0, 0)),
                pl.BlockSpec((1, Cf), lambda i: (0, 0)),
            ],
            out_specs=pl.BlockSpec((tm_eff, Cf), lambda i: (i, 0)),
        ),
        compiler_params=pltpu.CompilerParams(
            dimension_semantics=("parallel",),
            vmem_limit_bytes=_VMEM_LIMIT),
        cost_estimate=cost,
    )(x, w, b)

    return out.reshape(rows_p * fold, C)[:M]                  # free bitcast


def proj_bn_relu_avgpool(h, w, scale, bias, *, ts=512):
    """mean_S( relu(h @ (w * scale) + bias) ) fused in one kernel.

    h: (N, S, C), w: (C, F), scale/bias: (F,).  Returns (N, F) f32.
    """
    assert ts % 16 == 0
    N, S, C = h.shape
    Cw, F = w.shape
    assert C == Cw and F % 128 == 0

    w = (w.astype(jnp.float32) * scale.astype(jnp.float32)[None, :]
         ).astype(jnp.bfloat16)
    b = bias.astype(jnp.float32).reshape(1, F)

    ts_eff = ts if S >= ts else _round_up(S, 16)
    Sp = _round_up(S, ts_eff)
    if Sp != S:
        h = jnp.pad(h, ((0, 0), (0, Sp - S), (0, 0)))
    h = h.astype(jnp.bfloat16)

    cost = pl.CostEstimate(
        flops=2 * N * Sp * C * F,
        transcendentals=0,
        bytes_accessed=N * Sp * C * 2 + C * F * 2 + N * F * 4)

    out = pl.pallas_call(
        functools.partial(_proj_pool_kernel, s_true=S, ts=ts_eff),
        out_shape=jax.ShapeDtypeStruct((N, 1, F), jnp.float32),
        grid_spec=pltpu.PrefetchScalarGridSpec(
            num_scalar_prefetch=0,
            grid=(N, Sp // ts_eff),
            in_specs=[
                pl.BlockSpec((1, ts_eff, C), lambda n, s: (n, s, 0)),
                pl.BlockSpec((C, F), lambda n, s: (0, 0)),
                pl.BlockSpec((1, F), lambda n, s: (0, 0)),
            ],
            out_specs=pl.BlockSpec((1, 1, F), lambda n, s: (n, 0, 0)),
            scratch_shapes=[pltpu.VMEM((1, F), jnp.float32)],
        ),
        compiler_params=pltpu.CompilerParams(
            dimension_semantics=("parallel", "arbitrary"),
            vmem_limit_bytes=_VMEM_LIMIT),
        cost_estimate=cost,
    )(h, w, b)
    return out.reshape(N, F)


# ----------------------------------------------------------------------------
# JAX glue: im2col for 3x3 stride-2 pad-1 conv (patch extraction only, bf16;
# the matmul happens in the Pallas kernel above).
# ----------------------------------------------------------------------------
def im2col_3x3_s2(x_nhwc):
    N, H, W, Cin = x_nhwc.shape
    xp = jnp.pad(x_nhwc, ((0, 0), (1, 1), (1, 1), (0, 0)))
    Ho, Wo = H // 2, W // 2
    patches = []
    for dy in range(3):
        for dx in range(3):
            patches.append(xp[:, dy:dy + 2 * Ho:2, dx:dx + 2 * Wo:2, :])
    p = jnp.concatenate(patches, axis=-1)       # (N, Ho, Wo, 9*Cin), (ky,kx,cin)
    return p.reshape(N * Ho * Wo, 9 * Cin), (N, Ho, Wo)


# ----------------------------------------------------------------------------
# Parameter construction (deterministic, matching the __init__ init rules)
# ----------------------------------------------------------------------------
def he_conv_init(key, kh, kw, cin, cout):
    # nn.Conv2d init in the module: normal(0, sqrt(2 / (kh*kw*cout)))
    std = math.sqrt(2.0 / (kh * kw * cout))
    w = std * jax.random.normal(key, (kh, kw, cin, cout), dtype=jnp.float32)
    return w.reshape(kh * kw * cin, cout)


def xavier_uniform(key, fan_in, fan_out, gain):
    a = gain * math.sqrt(6.0 / (fan_in + fan_out))
    return jax.random.uniform(key, (fan_out, fan_in), jnp.float32, -a, a)


def init_cliff_params(key, cin=3, stem_c=64, feat_dim=128):
    ks = jax.random.split(key, 12)
    params = {
        # HRNet stem conv1 / conv2 (3x3, stride 2, BN weight=1 bias=0)
        "w1": he_conv_init(ks[0], 3, 3, cin, stem_c),
        "s1": jnp.ones((stem_c,), jnp.float32),
        "b1": jnp.zeros((stem_c,), jnp.float32),
        "w2": he_conv_init(ks[1], 3, 3, stem_c, stem_c),
        "s2": jnp.ones((stem_c,), jnp.float32),
        "b2": jnp.zeros((stem_c,), jnp.float32),
        # final 1x1 projection conv (stand-in for HRNet final_layer -> img feat)
        "wf": he_conv_init(ks[2], 1, 1, stem_c, feat_dim),
        "sf": jnp.ones((feat_dim,), jnp.float32),
        "bf": jnp.zeros((feat_dim,), jnp.float32),
        # SMPL mean-parameter buffers (synthetic, deterministic)
        "init_pose": 0.01 * jax.random.normal(ks[3], (1, 24 * 6), jnp.float32),
        "init_shape": 0.01 * jax.random.normal(ks[4], (1, 10), jnp.float32),
        "init_cam": jnp.array([[0.9, 0.0, 0.0]], jnp.float32),
        # Regressor head params (defined in __init__, NOT used by this forward)
        "decpose_w": xavier_uniform(ks[5], 1024, 24 * 6, 0.01),
        "decshape_w": xavier_uniform(ks[6], 1024, 10, 0.01),
        "deccam_w": xavier_uniform(ks[7], 1024, 3, 0.01),
    }
    return params


# ----------------------------------------------------------------------------
# CLIFF forward (matches the given PyTorch forward: returns encoder features)
# ----------------------------------------------------------------------------
def cliff_forward(params, x_nchw, bbox,
                  init_pose=None, init_shape=None, init_cam=None, n_iter=3):
    batch = x_nchw.shape[0]
    # mean-param broadcast (computed for fidelity; not part of the return value)
    if init_pose is None:
        init_pose = jnp.broadcast_to(params["init_pose"], (batch, 24 * 6))
    if init_shape is None:
        init_shape = jnp.broadcast_to(params["init_shape"], (batch, 10))
    if init_cam is None:
        init_cam = jnp.broadcast_to(params["init_cam"], (batch, 3))

    # ---- encoder (reduced HRNet stem stand-in), bf16 activations ------------
    x = jnp.transpose(x_nchw, (0, 2, 3, 1)).astype(jnp.bfloat16)   # NCHW->NHWC

    # conv1 3x3/s2 + BN + ReLU   (K=27 is tiny; accepted per perf review)
    p1, (n, h1, w1) = im2col_3x3_s2(x)
    h = matmul_bn_relu(p1, params["w1"], params["s1"], params["b1"])
    h = h.reshape(n, h1, w1, -1)

    # conv2 3x3/s2 + BN + ReLU
    p2, (n, h2, w2) = im2col_3x3_s2(h)
    h = matmul_bn_relu(p2, params["w2"], params["s2"], params["b2"])
    h = h.reshape(n, h2 * w2, -1)

    # fused final 1x1 conv + BN + ReLU + global average pool -> feature vector
    xf = proj_bn_relu_avgpool(h, params["wf"], params["sf"], params["bf"])
    return xf


# ----------------------------------------------------------------------------
if __name__ == "__main__":
    key = jax.random.PRNGKey(0)
    k_param, k_x, k_bbox = jax.random.split(key, 3)

    params = init_cliff_params(k_param, cin=3, stem_c=64, feat_dim=128)

    batch, cin, hw = 2, 3, 32
    x = jax.random.normal(k_x, (batch, cin, hw, hw), dtype=jnp.float32)  # NCHW
    bbox = jax.random.normal(k_bbox, (batch, 3), dtype=jnp.float32)

    xf = cliff_forward(params, x, bbox)
    xf = jax.block_until_ready(xf)

    assert xf.shape == (batch, 128), xf.shape
    assert jnp.all(jnp.isfinite(xf))
    print("KERNEL_OK")
</pallas_src>

<mosaic_0001>
module attributes {stable_mosaic.version = 11 : i64} {
  func.func @_matmul_bias_act_kernel(%arg0: i32, %arg1: memref<256x54xbf16, #tpu.memory_space<vmem>>, %arg2: memref<54x128xbf16, #tpu.memory_space<vmem>>, %arg3: memref<1x128xf32, #tpu.memory_space<vmem>>, %arg4: memref<256x128xbf16, #tpu.memory_space<vmem>>) attributes {dimension_semantics = [#tpu.dimension_semantics<parallel>], iteration_bounds = array<i64: 1>, scalar_prefetch = 0 : i64, scratch_operands = 0 : i64, tpu.core_type = #tpu.core_type<tc>, window_params = [{transform_indices = @transform_0, window_bounds = array<i64: 256, 54>}, {pipeline_mode = #tpu.pipeline_mode<synchronous>, transform_indices = @transform_1, window_bounds = array<i64: 54, 128>}, {pipeline_mode = #tpu.pipeline_mode<synchronous>, transform_indices = @transform_2, window_bounds = array<i64: 1, 128>}, {transform_indices = @transform_3, window_bounds = array<i64: 256, 128>}]} {
    %c0 = arith.constant 0 : index
    %c0_0 = arith.constant 0 : index
    %0 = vector.load %arg1[%c0, %c0_0] : memref<256x54xbf16, #tpu.memory_space<vmem>>, vector<256x54xbf16>
    %c0_1 = arith.constant 0 : index
    %c0_2 = arith.constant 0 : index
    %1 = vector.load %arg2[%c0_1, %c0_2] : memref<54x128xbf16, #tpu.memory_space<vmem>>, vector<54x128xbf16>
    %cst = arith.constant dense<0.000000e+00> : vector<256x128xf32>
    %2 = tpu.matmul %0, %1, %cst {dimension_numbers = #tpu.dot_dimension_numbers<[1], [0], [0], [1], [0, 0, 1, 1], [], []>} : vector<256x54xbf16>, vector<54x128xbf16>, vector<256x128xf32> -> vector<256x128xf32>
    %c0_3 = arith.constant 0 : index
    %c0_4 = arith.constant 0 : index
    %3 = vector.load %arg3[%c0_3, %c0_4] : memref<1x128xf32, #tpu.memory_space<vmem>>, vector<1x128xf32>
    %4 = vector.broadcast %3 : vector<1x128xf32> to vector<256x128xf32>
    %5 = arith.addf %2, %4 : vector<256x128xf32>
    %cst_5 = arith.constant 0.000000e+00 : f32
    %6 = vector.broadcast %cst_5 : f32 to vector<256x128xf32>
    %7 = arith.maximumf %5, %6 : vector<256x128xf32>
    %8 = arith.truncf %7 : vector<256x128xf32> to vector<256x128xbf16>
    %c0_6 = arith.constant 0 : index
    %c0_7 = arith.constant 0 : index
    %9 = vector.load %arg4[%c0_6, %c0_7] : memref<256x128xbf16, #tpu.memory_space<vmem>>, vector<256x128xbf16>
    tpu.vector_store %arg4[%c0_6, %c0_7], %8 {strides = array<i32>} : memref<256x128xbf16, #tpu.memory_space<vmem>>, vector<256x128xbf16>,
    return
  }
  func.func @transform_0(%arg0: i32) -> (i32, i32) {
    %c0_i32 = arith.constant 0 : i32
    %c0_i32_0 = arith.constant 0 : i32
    return %arg0, %c0_i32 : i32, i32
  }
  func.func @transform_1(%arg0: i32) -> (i32, i32) {
    %c0_i32 = arith.constant 0 : i32
    %c0_i32_0 = arith.constant 0 : i32
    %c0_i32_1 = arith.constant 0 : i32
    return %c0_i32, %c0_i32_0 : i32, i32
  }
  func.func @transform_2(%arg0: i32) -> (i32, i32) {
    %c0_i32 = arith.constant 0 : i32
    %c0_i32_0 = arith.constant 0 : i32
    %c0_i32_1 = arith.constant 0 : i32
    return %c0_i32, %c0_i32_0 : i32, i32
  }
  func.func @transform_3(%arg0: i32) -> (i32, i32) {
    %c0_i32 = arith.constant 0 : i32
    %c0_i32_0 = arith.constant 0 : i32
    return %arg0, %c0_i32 : i32, i32
  }
}

</mosaic_0001>

<bundles_post_ra>
// kernel: tpu_custom_call.1
= control target key start
LH: loop header
LB: loop body
LE: loop exit
PB: predicated region body
PF: predicated region fallthrough
CT: control target
= control target key end

     0   :  { %vm163_vm0 = vcmask 441344   ;;  %vm212_vm1 = vcmask 1042432   ;;  %s1046_s0 = inlined_call_operand.vmem [shape: bf16[256,54], index: 0, kind: input, shape index: {}]   ;;  %s1047_s1 = inlined_call_operand.vmem [shape: bf16[54,128], index: 1, kind: input, shape index: {}]   ;;  %s1048_s2 = inlined_call_operand.vmem [shape: f32[1,128], index: 2, kind: input, shape index: {}]   ;;  %s1049_s3 = inlined_call_operand.hbm [shape: bf16[256,128], index: 3, kind: output, shape index: {}]  }
   0x1   :  { %v854_v0 = vld [vmem:[%s1047_s1] sm:$0xff]   ;;  %v855_v1 = vld [vmem:[%s1047_s1 + $0x8] sm:$0xff]   ;;  %v856_v2 = vld [vmem:[%s1047_s1 + $0x10] sm:$0xff]  }
   0x2   :  { %801 = vmatprep.subr.bf16.mxu0 %v854_v0  ;;  %841 = vmatprep.subr.bf16.mxu1 %v854_v0  ;;  %v858_v3 = vld [vmem:[%s1046_s0] sm:$0xff]   ;;  %v857_v5 = vld [vmem:[%s1047_s1 + $0x18] ss:$0 sps:$4 sm:$0x77]   ;;  %v860_v7 = vld [vmem:[%s1046_s0 + $0x8] sm:$0xff]  }
   0x3   :  { %802 = vmatpush3.bf16.msra.mxu0 %v854_v0  ;;  %845 = vmatpush3.bf16.msra.mxu1 %v854_v0  ;;  %v859_v4 = vld [vmem:[%s1046_s0 + $0x40] sm:$0xff]   ;;  %v214_v6 = vsel %vm212_vm1, %v857_v5, 0  ;;  %v861_v8 = vld [vmem:[%s1046_s0 + $0x48] sm:$0xff]   ;;  %v862_v9 = vld [vmem:[%s1046_s0 + $0x10] sm:$0xff]  }
   0x4   :  { %803 = vmatprep.subr.bf16.mxu0 %v855_v1  ;;  %842 = vmatprep.subr.bf16.mxu1 %v855_v1  ;;  %v863_v10 = vld [vmem:[%s1046_s0 + $0x50] sm:$0xff]  }
   0x5   :  { %809 = vmatprep.mubr.msk.bf16.mxu0 %vm163_vm0, %v858_v3  ;;  %825 = vmatprep.mubr.msk.bf16.mxu1 %vm163_vm0, %v859_v4 }
   0x7   :  { %804 = vmatpush3.bf16.msra.mxu0 %v855_v1  ;;  %846 = vmatpush3.bf16.msra.mxu1 %v855_v1 }
   0x8   :  { %805 = vmatprep.subr.bf16.mxu0 %v856_v2  ;;  %843 = vmatprep.subr.bf16.mxu1 %v856_v2 }
   0xb   :  { %806 = vmatpush3.bf16.msra.mxu0 %v856_v2  ;;  %847 = vmatpush3.bf16.msra.mxu1 %v856_v2 }
   0xc   :  { %849 = vmatprep.subr.msk.bf16.mxu0 %vm212_vm1, %v857_v5  ;;  %850 = vmatprep.subr.msk.bf16.mxu1 %vm212_vm1, %v857_v5 }
   0xf   :  { %808 = vmatpush3.bf16.msra.mxu0 %v214_v6  ;;  %848 = vmatpush3.bf16.msra.mxu1 %v214_v6 }
  0x12   :  { %810 = vmatmul.mubr.msk.bf16.vlgmr.msra.gmra.mrb[0].mxu0 %vm163_vm0, %v860_v7  ;;  %826 = vmatmul.mubr.msk.bf16.vlgmr.msra.gmra.mrb[0].mxu1 %vm163_vm0, %v861_v8 }
  0x13   :  { %813 = vmatprep.mubr.msk.bf16.mxu0 %vm163_vm0, %v862_v9  ;;  %829 = vmatprep.mubr.msk.bf16.mxu1 %vm163_vm0, %v863_v10 }
  0x14   :  { %8 = vsyncpa [#allocation3], 0  ;;  %v864_v11 = vld [vmem:[%s1046_s0 + $0x18] sm:$0xff]   ;;  %v866_v13 = vld [vmem:[%s1046_s0 + $0x20] sm:$0xff]  }
  0x15   :  { %v865_v12 = vld [vmem:[%s1046_s0 + $0x58] sm:$0xff]   ;;  %v867_v14 = vld [vmem:[%s1046_s0 + $0x60] sm:$0xff]   ;;  %v868_v15 = vld [vmem:[%s1046_s0 + $0x28] sm:$0xff]  }
  0x16   :  { %v869_v16 = vld [vmem:[%s1046_s0 + $0x68] sm:$0xff]   ;;  %v870_v17 = vld [vmem:[%s1046_s0 + $0x30] sm:$0xff]   ;;  %v872_v19 = vld [vmem:[%s1046_s0 + $0x38] sm:$0xff]  }
  0x17   :  { %v871_v18 = vld [vmem:[%s1046_s0 + $0x70] sm:$0xff]   ;;  %v873_v20 = vld [vmem:[%s1046_s0 + $0x78] sm:$0xff]   ;;  %v1000_v21 = vld [vmem:[%s1048_s2] ss:$0 sm:$0xff]  ;;  %s898_s0 = smov [#allocation2]  }
  0x18   :  { %s574_s2 = sshll.u32 %s898_s0, 4  ;;  %s575_s2 = int_to_ptr.vmem [resolvable:$true] %s574_s2 }
  0x19   :  { %s874_s26 = scalar_lea.vmem %s575_s2, 2048  ;;  %p879_p1 = scmp.lt.s32.totalorder %s575_s2, %s575_s2 }
  0x1a   :  { %814 = vmatmul.mubr.msk.bf16.gmra.mrb[4].mxu0 %vm163_vm0, %v864_v11  ;;  %830 = vmatmul.mubr.msk.bf16.gmra.mrb[4].mxu1 %vm163_vm0, %v865_v12  ;;  %p875_p0 = scmp.ne.s32.totalorder %s575_s2, %s874_s26  ;;  %p880_p2 = scmp.lt.s32.totalorder %s874_s26, %s874_s26 }
  0x1b   :  { %817 = vmatprep.mubr.msk.bf16.mxu0 %vm163_vm0, %v866_v13  ;;  %833 = vmatprep.mubr.msk.bf16.mxu1 %vm163_vm0, %v867_v14 }
  0x1c   :  { %p881_p3 = por %p880_p2, %p879_p1 }
  0x1e   :  { %p882_p4 = pnand %p881_p3, %p875_p0 }
  0x22   :  { %818 = vmatmul.mubr.msk.bf16.gmra.mrb[8].mxu0 %vm163_vm0, %v868_v15  ;;  %834 = vmatmul.mubr.msk.bf16.gmra.mrb[8].mxu1 %vm163_vm0, %v869_v16 }
  0x23   :  { %821 = vmatprep.mubr.msk.bf16.mxu0 %vm163_vm0, %v870_v17  ;;  %837 = vmatprep.mubr.msk.bf16.mxu1 %vm163_vm0, %v871_v18 }
  0x2a   :  { %822 = vmatmul.mubr.msk.bf16.gmra.mrb[12].mxu0 %vm163_vm0, %v872_v19  ;;  %838 = vmatmul.mubr.msk.bf16.gmra.mrb[12].mxu1 %vm163_vm0, %v873_v20 }
  0xe5   :  { %v811_v22 = vpop.f32.mrb[0].mxu0  ;;  %v827_v23 = vpop.f32.mrb[0].mxu1 }
  0xe6   :  { %v259_v24 = vadd.f32 %v811_v22, %v1000_v21  ;;  %v323_v25 = vadd.f32 %v827_v23, %v1000_v21  ;;  %v250_v26 = vpop.f32.mrb[1].mxu0  ;;  %v314_v27 = vpop.f32.mrb[1].mxu1 }
  0xe7   :  { %v251_v28 = vadd.f32 %v1000_v21, %v250_v26  ;;  %v315_v29 = vadd.f32 %v1000_v21, %v314_v27  ;;  %v812_v30 = vpop.f32.mrb[2].mxu0  ;;  %v828_v31 = vpop.f32.mrb[2].mxu1 }
  0xe8   :  { %v262_v32 = vadd.f32 %v812_v30, %v1000_v21  ;;  %v326_v33 = vadd.f32 %v828_v31, %v1000_v21  ;;  %v253_v34 = vpop.f32.mrb[3].mxu0  ;;  %v317_v35 = vpop.f32.mrb[3].mxu1  ;;  %v379_v38 = vmax.f32 %v259_v24, 0.0  ;;  %v395_v39 = vmax.f32 %v323_v25, 0.0 }
  0xe9   :  { %v254_v36 = vadd.f32 %v1000_v21, %v253_v34  ;;  %v318_v37 = vadd.f32 %v1000_v21, %v317_v35  ;;  %v377_v42 = vmax.f32 %v251_v28, 0.0  ;;  %v393_v43 = vmax.f32 %v315_v29, 0.0 }
  0xea   :  { %v380_v40 = vmax.f32 %v262_v32, 0.0  ;;  %v396_v41 = vmax.f32 %v326_v33, 0.0 }
  0xeb   :  { %v378_v44 = vmax.f32 %v254_v36, 0.0  ;;  %v394_v45 = vmax.f32 %v318_v37, 0.0 }
  0xec   :  { %v694_v46 = vpack.c.bf16 %v380_v40, %v379_v38  ;;  %v734_v47 = vpack.c.bf16 %v396_v41, %v395_v39 }
  0xed   :  { %v689_v48 = vpack.c.bf16 %v378_v44, %v377_v42  ;;  %v729_v49 = vpack.c.bf16 %v394_v45, %v393_v43  ;;  %v815_v50 = vpop.f32.mrb[4].mxu0  ;;  %v831_v51 = vpop.f32.mrb[4].mxu1 }
  0xee   :  { %766 = vst [vmem:[#allocation2 + $0x8] sm:$0xff] %v694_v46   ;;  %774 = vst [vmem:[#allocation2 + $0x48] sm:$0xff] %v734_v47   ;;  %v275_v52 = vadd.f32 %v815_v50, %v1000_v21  ;;  %v339_v53 = vadd.f32 %v831_v51, %v1000_v21  ;;  %v266_v54 = vpop.f32.mrb[5].mxu0  ;;  %v330_v55 = vpop.f32.mrb[5].mxu1 }
  0xef   :  { %690 = vst [vmem:[#allocation2] sm:$0xff] %v689_v48   ;;  %773 = vst [vmem:[#allocation2 + $0x40] sm:$0xff] %v729_v49   ;;  %v267_v56 = vadd.f32 %v1000_v21, %v266_v54  ;;  %v331_v57 = vadd.f32 %v1000_v21, %v330_v55  ;;  %v816_v58 = vpop.f32.mrb[6].mxu0  ;;  %v832_v59 = vpop.f32.mrb[6].mxu1 }
  0xf0   :  { %v278_v60 = vadd.f32 %v816_v58, %v1000_v21  ;;  %v342_v61 = vadd.f32 %v832_v59, %v1000_v21  ;;  %v269_v62 = vpop.f32.mrb[7].mxu0  ;;  %v333_v63 = vpop.f32.mrb[7].mxu1  ;;  %v383_v2 = vmax.f32 %v275_v52, 0.0  ;;  %v399_v3 = vmax.f32 %v339_v53, 0.0 }
  0xf1   :  { %v270_v0 = vadd.f32 %v1000_v21, %v269_v62  ;;  %v334_v1 = vadd.f32 %v1000_v21, %v333_v63  ;;  %v381_v6 = vmax.f32 %v267_v56, 0.0  ;;  %v397_v7 = vmax.f32 %v331_v57, 0.0 }
  0xf2   :  { %v384_v4 = vmax.f32 %v278_v60, 0.0  ;;  %v400_v5 = vmax.f32 %v342_v61, 0.0 }
  0xf3   :  { %v382_v8 = vmax.f32 %v270_v0, 0.0  ;;  %v398_v9 = vmax.f32 %v334_v1, 0.0 }
  0xf4   :  { %v704_v10 = vpack.c.bf16 %v384_v4, %v383_v2  ;;  %v744_v11 = vpack.c.bf16 %v400_v5, %v399_v3 }
  0xf5   :  { %v699_v12 = vpack.c.bf16 %v382_v8, %v381_v6  ;;  %v739_v13 = vpack.c.bf16 %v398_v9, %v397_v7  ;;  %v819_v14 = vpop.f32.mrb[8].mxu0  ;;  %v835_v15 = vpop.f32.mrb[8].mxu1 }
  0xf6   :  { %768 = vst [vmem:[#allocation2 + $0x18] sm:$0xff] %v704_v10   ;;  %776 = vst [vmem:[#allocation2 + $0x58] sm:$0xff] %v744_v11   ;;  %v291_v16 = vadd.f32 %v819_v14, %v1000_v21  ;;  %v355_v17 = vadd.f32 %v835_v15, %v1000_v21  ;;  %v282_v18 = vpop.f32.mrb[9].mxu0  ;;  %v346_v19 = vpop.f32.mrb[9].mxu1 }
  0xf7   :  { %767 = vst [vmem:[#allocation2 + $0x10] sm:$0xff] %v699_v12   ;;  %775 = vst [vmem:[#allocation2 + $0x50] sm:$0xff] %v739_v13   ;;  %v283_v20 = vadd.f32 %v1000_v21, %v282_v18  ;;  %v347_v22 = vadd.f32 %v1000_v21, %v346_v19  ;;  %v820_v23 = vpop.f32.mrb[10].mxu0  ;;  %v836_v24 = vpop.f32.mrb[10].mxu1 }
  0xf8   :  { %v294_v25 = vadd.f32 %v820_v23, %v1000_v21  ;;  %v358_v26 = vadd.f32 %v836_v24, %v1000_v21  ;;  %v285_v27 = vpop.f32.mrb[11].mxu0  ;;  %v349_v28 = vpop.f32.mrb[11].mxu1  ;;  %v387_v31 = vmax.f32 %v291_v16, 0.0  ;;  %v403_v32 = vmax.f32 %v355_v17, 0.0 }
  0xf9   :  { %v286_v29 = vadd.f32 %v1000_v21, %v285_v27  ;;  %v350_v30 = vadd.f32 %v1000_v21, %v349_v28  ;;  %v385_v35 = vmax.f32 %v283_v20, 0.0  ;;  %v401_v36 = vmax.f32 %v347_v22, 0.0 }
  0xfa   :  { %v388_v33 = vmax.f32 %v294_v25, 0.0  ;;  %v404_v34 = vmax.f32 %v358_v26, 0.0 }
  0xfb   :  { %v386_v37 = vmax.f32 %v286_v29, 0.0  ;;  %v402_v38 = vmax.f32 %v350_v30, 0.0 }
  0xfc   :  { %v714_v39 = vpack.c.bf16 %v388_v33, %v387_v31  ;;  %v754_v40 = vpack.c.bf16 %v404_v34, %v403_v32 }
  0xfd   :  { %v709_v41 = vpack.c.bf16 %v386_v37, %v385_v35  ;;  %v749_v42 = vpack.c.bf16 %v402_v38, %v401_v36  ;;  %v823_v43 = vpop.f32.mrb[12].mxu0  ;;  %v839_v44 = vpop.f32.mrb[12].mxu1 }
  0xfe   :  { %770 = vst [vmem:[#allocation2 + $0x28] sm:$0xff] %v714_v39   ;;  %778 = vst [vmem:[#allocation2 + $0x68] sm:$0xff] %v754_v40   ;;  %v307_v45 = vadd.f32 %v823_v43, %v1000_v21  ;;  %v371_v46 = vadd.f32 %v839_v44, %v1000_v21  ;;  %v298_v47 = vpop.f32.mrb[13].mxu0  ;;  %v362_v48 = vpop.f32.mrb[13].mxu1 }
  0xff   :  { %769 = vst [vmem:[#allocation2 + $0x20] sm:$0xff] %v709_v41   ;;  %777 = vst [vmem:[#allocation2 + $0x60] sm:$0xff] %v749_v42   ;;  %v299_v49 = vadd.f32 %v1000_v21, %v298_v47  ;;  %v363_v50 = vadd.f32 %v1000_v21, %v362_v48  ;;  %v824_v51 = vpop.f32.mrb[14].mxu0  ;;  %v840_v52 = vpop.f32.mrb[14].mxu1 }
 0x100   :  { %v310_v53 = vadd.f32 %v824_v51, %v1000_v21  ;;  %v374_v54 = vadd.f32 %v840_v52, %v1000_v21  ;;  %v301_v55 = vpop.f32.mrb[15].mxu0  ;;  %v365_v56 = vpop.f32.mrb[15].mxu1  ;;  %v391_v59 = vmax.f32 %v307_v45, 0.0  ;;  %v407_v60 = vmax.f32 %v371_v46, 0.0 }
 0x101   :  { %v302_v57 = vadd.f32 %v1000_v21, %v301_v55  ;;  %v366_v58 = vadd.f32 %v1000_v21, %v365_v56  ;;  %v389_v63 = vmax.f32 %v299_v49, 0.0  ;;  %v405_v0 = vmax.f32 %v363_v50, 0.0 }
 0x102   :  { %v392_v61 = vmax.f32 %v310_v53, 0.0  ;;  %v408_v62 = vmax.f32 %v374_v54, 0.0 }
 0x103   :  { %v390_v1 = vmax.f32 %v302_v57, 0.0  ;;  %v406_v2 = vmax.f32 %v366_v58, 0.0 }
 0x104   :  { %v724_v3 = vpack.c.bf16 %v392_v61, %v391_v59  ;;  %v764_v4 = vpack.c.bf16 %v408_v62, %v407_v60 }
 0x105   :  { %v719_v5 = vpack.c.bf16 %v390_v1, %v389_v63  ;;  %v759_v6 = vpack.c.bf16 %v406_v2, %v405_v0 }
 0x106   :  { %772 = vst [vmem:[#allocation2 + $0x38] sm:$0xff] %v724_v3   ;;  %780 = vst [vmem:[#allocation2 + $0x78] sm:$0xff] %v764_v4  }
 0x107   :  { %771 = vst [vmem:[#allocation2 + $0x30] sm:$0xff] %v719_v5   ;;  %779 = vst [vmem:[#allocation2 + $0x70] sm:$0xff] %v759_v6  }
 0x108   :  { %885 = shalt.err (!%p882_p4)
}
 0x109   :  { %s886_s28 = scalar_lea.hbm %s1049_s3, 2048 }
 0x10a   :  { %p887_p5 = scmp.ne.s32.totalorder %s1049_s3, %s886_s28  ;;  %p890_p6 = scmp.lt.u32.totalorder %s886_s28, %s1049_s3 }
 0x10c   :  { %p892_p7 = pnand %p890_p6, %p887_p5 }
 0x10e   :  { %895 = shalt.err (!%p892_p7)
}
 0x10f   :  { %s899_s6 = smov 64   ;;  %s900_s7 = smov 4  }
 0x110   :  { %580 = dma.vmem_to_hbm [thread:$0]  %s575_s2, 2048, %s1049_s3, [#allocation3], %s899_s6, %s899_s6, %s900_s7  }
 0x111   :  { %896 = dma.done.wait [#allocation3], 2048  }
 0x112   :  { %897 = vsyncadd [#allocation3], 4294965248 }
 0x113   :  { %584 = vsyncpa [#allocation3], 1 }

</bundles_post_ra>
